<compile_context>
chip_gen: v6e
topology: v6e:2x2x1
jax: 0.10.0
libtpu: 0.0.40
codegen_flags: <defaults>
</compile_context>

<pallas_src>
import functools

import jax
import jax.numpy as jnp
from jax.experimental import pallas as pl
from jax.experimental.pallas import tpu as pltpu


def _sublane(dtype) -> int:
    """Native sublane multiple for a dtype (packed layouts)."""
    return {4: 8, 2: 16, 1: 32}.get(jnp.dtype(dtype).itemsize, 8)


def _round_up(n: int, m: int) -> int:
    return ((n + m - 1) // m) * m


def _crusher_kernel(x_ref, off_ref, o_ref, *, num_particles, embedding_size,
                    out_dtype):
    # x_ref:   (TM, E)    rows of the flattened (B*S, E) input (native dtype)
    # off_ref: (1, P*E)   lane-dense particle offsets (parameter dtype), resident
    # o_ref:   (TM, P*E)  lane-dense output slab (promoted dtype)
    x = x_ref[...].astype(out_dtype)
    off = off_ref[...].astype(out_dtype)                 # small (1, P*E) block
    if embedding_size % 128 == 0:
        # Full-width, lane-aligned slab stores per particle; no XLU replication.
        for p in range(num_particles):
            lo = p * embedding_size
            hi = lo + embedding_size
            o_ref[:, lo:hi] = x + off[:, lo:hi]
    else:
        # E is not a multiple of 128 (e.g. E=32): replicate lanes once so the
        # add + store is one unmasked full-width slab instead of P masked
        # partial stores.
        x_rep = jnp.tile(x, (1, num_particles))          # (TM, P*E)
        o_ref[...] = x_rep + off                         # off broadcasts over rows


def particle_crusher(x, off_sets, *,
                     vmem_block_budget_bytes=26 * 1024 * 1024,
                     vmem_limit_bytes=40 * 1024 * 1024,
                     min_output_bytes=1 << 20):
    """x: (B, S, E); off_sets: (1, 1, P, E) -> (B, S, P, E)."""
    B, S, E = x.shape
    assert off_sets.ndim == 4 and off_sets.shape[0] == 1 and off_sets.shape[1] == 1
    assert off_sets.shape[3] == E
    P = off_sets.shape[2]
    PE = P * E

    # Match PyTorch type promotion: parameter is typically f32; compute the add
    # in the promoted dtype and return it.
    out_dtype = jnp.promote_types(x.dtype, off_sets.dtype)
    itemsize_in = jnp.dtype(x.dtype).itemsize
    itemsize_off = jnp.dtype(off_sets.dtype).itemsize
    itemsize_out = jnp.dtype(out_dtype).itemsize

    N = B * S
    out_bytes = N * PE * itemsize_out
    if out_bytes < min_output_bytes:
        # Tiny workloads: kernel launch / pipeline setup dominates; the XLA-fused
        # broadcast add hits the same HBM roofline with no overhead.
        return x.reshape(B, S, 1, E) + off_sets

    # Free wrapper-side layout plumbing (contiguous-dim reshapes only).
    x2d = x.reshape(N, E)                                # (N, E)
    off1d = off_sets.reshape(1, PE)                      # (1, P*E) lane-dense

    # TODO(synk): if P*E is not a multiple of 128 the trailing output dim is not
    # lane-dense and stores become masked partials; pad P*E up to 128 in the
    # wrapper (and slice afterwards) if that case ever shows up hot.

    sublane = max(_sublane(x.dtype), _sublane(out_dtype))

    # Row tile from the full double-buffered VMEM footprint:
    #   2x out block + 2x in block (+ one out-block-sized temp if the tile
    #   branch materializes the lane replication).
    tile_branch = (E % 128 != 0)
    per_row_bytes = (2 * PE * itemsize_out
                     + 2 * E * itemsize_in
                     + (PE * itemsize_out if tile_branch else 0))
    rows_budget = max(sublane,
                      (vmem_block_budget_bytes // per_row_bytes) // sublane * sublane)

    if N <= sublane:
        tm = N                                   # single full block; cannot split
    else:
        # Never collapse to a 1-step grid (keeps both v7x TensorCores busy and
        # keeps the DMA pipeline alive); tm stays sublane-aligned.
        tm = max(sublane, min(rows_budget, ((N - 1) // sublane) * sublane))
        steps = pl.cdiv(N, tm)
        if steps % 2 == 1:                       # best-effort even step count
            cand = _round_up(pl.cdiv(N, steps + 1), sublane)
            if sublane <= cand <= tm and pl.cdiv(N, cand) % 2 == 0:
                tm = cand
    grid = (pl.cdiv(N, tm),)

    footprint = tm * per_row_bytes + 2 * PE * itemsize_off
    assert footprint <= vmem_limit_bytes, (
        f"VMEM footprint {footprint} exceeds limit {vmem_limit_bytes}")

    kernel = functools.partial(_crusher_kernel, num_particles=P,
                               embedding_size=E, out_dtype=out_dtype)

    cost = pl.CostEstimate(
        flops=N * PE,
        transcendentals=0,
        bytes_accessed=(N * E * itemsize_in + PE * itemsize_off
                        + N * PE * itemsize_out),
    )

    out2d = pl.pallas_call(
        kernel,
        out_shape=jax.ShapeDtypeStruct((N, PE), out_dtype),
        grid_spec=pltpu.PrefetchScalarGridSpec(
            num_scalar_prefetch=0,
            grid=grid,
            in_specs=[
                pl.BlockSpec((tm, E), lambda i: (i, 0)),
                pl.BlockSpec((1, PE), lambda i: (0, 0)),   # constant -> resident
            ],
            out_specs=pl.BlockSpec((tm, PE), lambda i: (i, 0)),
        ),
        compiler_params=pltpu.CompilerParams(
            dimension_semantics=("parallel",),
            vmem_limit_bytes=vmem_limit_bytes,
        ),
        cost_estimate=cost,
    )(x2d, off1d)

    # Free reshape back to the module's output layout.
    return out2d.reshape(B, S, P, E)


if __name__ == "__main__":
    # Small shapes consistent with the module's forward.
    B, S, E, P = 2, 8, 32, 4

    key = jax.random.PRNGKey(0)
    kx, koff = jax.random.split(key)
    x = jax.random.normal(kx, (B, S, E), dtype=jnp.float32)
    # Module __init__ uses zeros; use small deterministic values so the
    # broadcast add is actually exercised (same shape as the nn.Parameter).
    off_sets = 0.01 * jax.random.normal(koff, (1, 1, P, E), dtype=jnp.float32)

    # min_output_bytes=0 forces the Pallas path for this tiny demo (the default
    # threshold would route ~8 KiB of output to the XLA-fused fallback).
    out = particle_crusher(x, off_sets, min_output_bytes=0)
    out = jax.block_until_ready(out)

    # Reference in plain JAX (mirrors the PyTorch forward exactly).
    ref = x.reshape(B, S, 1, E) + off_sets
    assert out.shape == (B, S, P, E)
    assert out.dtype == ref.dtype
    assert jnp.allclose(out, ref, atol=1e-6), "mismatch vs reference"

    print("KERNEL_OK")
</pallas_src>

<mosaic_0001>
module attributes {stable_mosaic.version = 11 : i64} {
  func.func @_crusher_kernel(%arg0: i32, %arg1: memref<8x32xf32, #tpu.memory_space<vmem>>, %arg2: memref<1x128xf32, #tpu.memory_space<vmem>>, %arg3: memref<8x128xf32, #tpu.memory_space<vmem>>) attributes {dimension_semantics = [#tpu.dimension_semantics<parallel>], iteration_bounds = array<i64: 2>, scalar_prefetch = 0 : i64, scratch_operands = 0 : i64, tpu.core_type = #tpu.core_type<tc>, window_params = [{transform_indices = @transform_0, window_bounds = array<i64: 8, 32>}, {pipeline_mode = #tpu.pipeline_mode<synchronous>, transform_indices = @transform_1, window_bounds = array<i64: 1, 128>}, {transform_indices = @transform_2, window_bounds = array<i64: 8, 128>}]} {
    %c0 = arith.constant 0 : index
    %c0_0 = arith.constant 0 : index
    %0 = vector.load %arg1[%c0, %c0_0] : memref<8x32xf32, #tpu.memory_space<vmem>>, vector<8x32xf32>
    %c0_1 = arith.constant 0 : index
    %c0_2 = arith.constant 0 : index
    %1 = vector.load %arg2[%c0_1, %c0_2] : memref<1x128xf32, #tpu.memory_space<vmem>>, vector<1x128xf32>
    %2 = tpu.concatenate %0, %0, %0, %0 in 1 : vector<8x32xf32>, vector<8x32xf32>, vector<8x32xf32>, vector<8x32xf32> -> vector<8x128xf32>
    %3 = vector.broadcast %1 : vector<1x128xf32> to vector<8x128xf32>
    %4 = arith.addf %2, %3 : vector<8x128xf32>
    %c0_3 = arith.constant 0 : index
    %c0_4 = arith.constant 0 : index
    %5 = vector.load %arg3[%c0_3, %c0_4] : memref<8x128xf32, #tpu.memory_space<vmem>>, vector<8x128xf32>
    tpu.vector_store %arg3[%c0_3, %c0_4], %4 {strides = array<i32>} : memref<8x128xf32, #tpu.memory_space<vmem>>, vector<8x128xf32>,
    return
  }
  func.func @transform_0(%arg0: i32) -> (i32, i32) {
    %c0_i32 = arith.constant 0 : i32
    %c0_i32_0 = arith.constant 0 : i32
    return %arg0, %c0_i32 : i32, i32
  }
  func.func @transform_1(%arg0: i32) -> (i32, i32) {
    %c0_i32 = arith.constant 0 : i32
    %c0_i32_0 = arith.constant 0 : i32
    %c0_i32_1 = arith.constant 0 : i32
    return %c0_i32, %c0_i32_0 : i32, i32
  }
  func.func @transform_2(%arg0: i32) -> (i32, i32) {
    %c0_i32 = arith.constant 0 : i32
    %c0_i32_0 = arith.constant 0 : i32
    return %arg0, %c0_i32 : i32, i32
  }
}

</mosaic_0001>

<bundles_post_ra>
// kernel: tpu_custom_call.1
= control target key start
LH: loop header
LB: loop body
LE: loop exit
PB: predicated region body
PF: predicated region fallthrough
CT: control target
= control target key end

     0   :  { %7 = vsyncpa [#allocation3], 0  ;;  %s589_s0 = inlined_call_operand.hbm [shape: f32[16,32], index: 0, kind: input, shape index: {}]   ;;  %s590_s1 = inlined_call_operand.vmem [shape: f32[1,128], index: 1, kind: input, shape index: {}]   ;;  %s591_s2 = inlined_call_operand.hbm [shape: f32[16,128], index: 2, kind: output, shape index: {}]  }
   0x1   :  { %9 = vsyncpa [#allocation3 + $0x1], 0 }
   0x2   :  { %10 = vsyncpa [#allocation4], 0 }
   0x3   :  { %12 = vsyncpa [#allocation4 + $0x1], 0  ;;  %s445_s9 = smov 0   ;;  %s447_s10 = smov 0  }
   0x4   :  { %s449_s11 = smov 0   ;;  %s451_s12 = smov 0  }
   0x5 LB: > { %s466_s13 = sadd.s32 4294967295, %s423_s12   ;;  %s269_s14 = sadd.s32 4294967294, %s423_s12   ;;  %s423_s12 = sphi %s451_s12, %s608_s12   ;;  %s419_s11 = sphi %s449_s11, %s607_s11   ;;  %s415_s10 = sphi %s447_s10, %s606_s10   ;;  %s411_s9 = sphi %s445_s9, %s605_s9  }
   0x6   : > { %s470_s15 = sadd.s32 1, %s423_s12   ;;  %s25_s16 = sadd.s32 1, %s419_s11 }
   0x7   : > { %s22_s17 = ssub.s32 %s423_s12, %s470_s15  ;;  %p32_p0 = scmp.ne.s32.totalorder %s419_s11, %s415_s10 }
   0x8   : > { %p23_p1 = scmp.eq.s32.totalorder %s22_s17, 0  ;;  %p33_p2 = scmp.eq.s32.totalorder %s423_s12, 0 }
   0x9   : > { %p38_p3 = scmp.ne.s32.totalorder %s415_s10, %s411_s9  ;;  %p39_p4 = scmp.eq.s32.totalorder %s466_s13, 0 }
   0xa   : > { %s482_s18 = scalar_select %p23_p1, %s419_s11, %s25_s16  }
   0xb   : > { %p484_p5 = por %p33_p2, %p32_p0  ;;  %p488_p6 = por %p39_p4, %p38_p3 }
   0xc   : > { %p83_p7 = scmp.eq.s32.totalorder %s466_s13, 1  ;;  %p89_p8 = scmp.eq.s32.totalorder %s269_s14, 1 }
   0xd   : > { %s595_s20 = scalar_select %p488_p6, 1, 0 }
   0xe   : > { %p294_p10 = scmp.lt.s32.totalorder %s423_s12, 2  ;;  %p495_p11 = por %p83_p7, %p32_p0 }
   0xf   : > { %p499_p12 = por %p89_p8, %p38_p3  ;;  %s112_s23 = sand.u32 1, %s419_s11  }
  0x10   : > { %s596_s21 = scalar_select %p495_p11, 1, 0 }
  0x11   : > { %s597_s22 = scalar_select %p499_p12, 1, 0 }
  0x12   : > { %s273_s24 = sshll.u32 %s423_s12, 7  ;;  %s272_s25 = sshll.u32 %s112_s23, 3 }
  0x13   : > { %s508_s28 = scalar_lea.hbm %s589_s0, %s273_s24  ;;  %s116_s29 = scalar_lea.vmem [#allocation2], %s272_s25 }
  0x14   : > { %s123_s30 = sshll.u32 %s116_s29, 4  ;;  %p512_p13 = pnand %p294_p10, %p484_p5  ;;  %s516_s30 = int_to_ptr.vmem [resolvable:$true] %s123_s30 }
  0x15   : > { %s113_s4 = scalar_lea.sflag [#allocation3], %s112_s23  ;;  %s331_s5 = scalar_lea.hbm %s508_s28, 128 }
  0x16   : > { %p332_p2 = scmp.ne.s32.totalorder %s508_s28, %s331_s5  ;;  %p333_p3 = pneg %p512_p13 }
  0x17   : > { %s336_s8 = scalar_lea.hbm %s589_s0, 256  ;;  %p337_p5 = scmp.lt.s32.totalorder %s508_s28, %s589_s0 }
  0x18   : > { %p334_p4 = pnand %p333_p3, %p332_p2  ;;  %p338_p8 = scmp.lt.s32.totalorder %s336_s8, %s331_s5 }
  0x1a   : > { %p335_p7 = pneg %p334_p4  ;;  %p339_p10 = por %p338_p8, %p337_p5 }
  0x1c   : > { %p340_p9 = pnand %p339_p10, %p335_p7 }
  0x1e   : > { %343 = shalt.err (!%p340_p9)
}
  0x1f   : > { %s344_s17 = scalar_lea.vmem %s516_s30, 128  ;;  %s425_s19 = smov [#allocation2]  }
  0x20   : > { %p345_p0 = scmp.ne.s32.totalorder %s516_s30, %s344_s17  ;;  %s349_s23 = sshll.u32 %s425_s19, 4  ;;  %s350_s23 = int_to_ptr.vmem [resolvable:$false] %s349_s23 }
  0x21   : > { %s351_s24 = scalar_lea.vmem %s350_s23, 256  ;;  %p352_p4 = scmp.lt.s32.totalorder %s516_s30, %s350_s23 }
  0x22   : > { %p347_p1 = pnand %p345_p0, %p333_p3  ;;  %p353_p12 = scmp.lt.s32.totalorder %s351_s24, %s344_s17 }
  0x24   : > { %p348_p2 = pneg %p347_p1  ;;  %p354_p11 = por %p353_p12, %p352_p4 }
  0x26   : > { %p355_p6 = pnand %p354_p11, %p348_p2 }
  0x28   : > { %358 = shalt.err (!%p355_p6)
}
  0x29   : > { %289 = dma.hbm_to_vmem [thread:$0]  (!%p512_p13), %s508_s28, 128, %s516_s30, %s113_s4  }
  0x2a   : > { %p599_p9 = scmp.lt.s32.totalorder %s423_s12, 3  ;;  %p600_p7 = scmp.ge.s32.totalorder %s423_s12, 1 }
  0x2c   : > { %p129_p0 = pnand %p600_p7, %p599_p9 }
  0x2d   : > { %s543_s25 = sand.u32 (!%p129_p0), 1, %s415_s10   ;;  %p601_p6 = scmp.ne.s32.totalorder (!%p129_p0), %s595_s20, 0 }
  0x2e   : > { %132 = sbr.rel (%p129_p0) target bundleno = 189 (0xbd), region = 28  ;;  %s275_s26 = sshll.u32 (!%p129_p0), %s543_s25, 3 }
  0x2f   : > { %s135_s27 = scalar_lea.sflag (!%p129_p0), [#allocation3], %s543_s25  ;;  %s138_s29 = scalar_lea.vmem (!%p129_p0), [#allocation2], %s275_s26 }
  0x33   : > { %402 = dma.done.wait (%p601_p6), %s135_s27, 128  }
  0x34   : > { %404 = vsyncadd (%p601_p6), %s135_s27, 4294967168  ;;  %v159_v0 = vld [vmem:[%s138_s29] sm:$0xff]  ;;  %s426_s28 = smov 32   ;;  %s427_s30 = smov 96   ;;  %vm171_vm0 = vcmask 261120   ;;  %vm173_vm1 = vcmask 523264  }
  0x35   : > { %162 = vrot.lane.b32.xlu0 %v159_v0, %s426_s28  ;;  %168 = vrot.lane.b32.xlu1 %v159_v0, %s427_s30  ;;  %s428_s3 = smov 64   ;;  %vm175_vm2 = vcmask 785408   ;;  %v277_v5 = vld [vmem:[%s590_s1] ss:$0 sm:$0xff]  ;;  %s279_s5 = sshll.u32 %s466_s13, 7 }
  0x36   : > { %s158_s6 = scalar_lea.vmem [#allocation5], %s275_s26  ;;  %s197_s16 = scalar_lea.hbm %s591_s2, %s279_s5 }
  0x37   : > { %s199_s7 = sshll.u32 %s158_s6, 4  ;;  %s186_s17 = scalar_lea.sflag [#allocation4], %s543_s25  ;;  %s200_s7 = int_to_ptr.vmem [resolvable:$true] %s199_s7 }
  0x38   : > { %s359_s19 = scalar_lea.vmem %s200_s7, 128  ;;  %p602_p12 = scmp.ne.s32.totalorder %s596_s21, 0 }
  0x39   : > { %165 = vrot.lane.b32.xlu0 %v159_v0, %s428_s3  ;;  %p360_p11 = scmp.ne.s32.totalorder %s200_s7, %s359_s19  ;;  %s429_s23 = smov [#allocation5]  }
  0x3a   : > { %s363_s24 = sshll.u32 %s429_s23, 4  ;;  %s364_s24 = int_to_ptr.vmem [resolvable:$false] %s363_s24 }
  0x3b   : > { %p361_p13 = pnand %p360_p11, %p602_p12  ;;  %s365_s13 = scalar_lea.vmem %s364_s24, 256 }
  0x3c   : > { %p366_p3 = scmp.lt.s32.totalorder %s200_s7, %s364_s24  ;;  %p367_p5 = scmp.lt.s32.totalorder %s365_s13, %s359_s19 }
  0x3d   : > { %p362_p1 = pneg %p361_p13 }
  0x3e   : > { %p368_p8 = por %p367_p5, %p366_p3 }
  0x40   : > { %p369_p10 = pnand %p368_p8, %p362_p1 }
  0xa7   : > { %v163_v1 = vpop.permute.xlu0 %162  ;;  %v169_v2 = vpop.permute.xlu1 %168 }
  0xa8   : > { %v172_v3 = vsel %vm171_vm0, %v159_v0, %v163_v1 }
  0xab   : > { %v166_v4 = vpop.permute.xlu0 %165 }
  0xac   : > { %v174_v6 = vsel %vm173_vm1, %v172_v3, %v166_v4 }
  0xad   : > { %v176_v7 = vsel %vm175_vm2, %v174_v6, %v169_v2 }
  0xae   : > { %v183_v8 = vadd.f32 %v277_v5, %v176_v7 }
  0xb0   : > { %184 = vst [vmem:[%s158_s6] sm:$0xff] %v183_v8 }
  0xb1   : > { %372 = shalt.err (!%p369_p10)
}
  0xb2   : > { %s373_s26 = scalar_lea.hbm %s197_s16, 128  ;;  %s377_s29 = scalar_lea.hbm %s591_s2, 256 }
  0xb3   : > { %p374_p2 = scmp.ne.s32.totalorder %s197_s16, %s373_s26  ;;  %p378_p7 = scmp.lt.s32.totalorder %s197_s16, %s591_s2 }
  0xb4   : > { %p379_p0 = scmp.lt.s32.totalorder %s377_s29, %s373_s26 }
  0xb5   : > { %p375_p4 = pnand %p374_p2, %p602_p12 }
  0xb6   : > { %p380_p6 = por %p379_p0, %p378_p7 }
  0xb7   : > { %p376_p9 = pneg %p375_p4 }
  0xb9   : > { %p381_p11 = pnand %p380_p6, %p376_p9 }
  0xbb   : > { %384 = shalt.err (!%p381_p11)
}
  0xbc   : > { %284 = dma.vmem_to_hbm [thread:$0]  (%p602_p12), %s200_s7, 128, %s197_s16, %s186_s17  }
  0xbd PF: > { %s211_s3 = sand.u32 1, %s411_s9   ;;  %p603_p13 = scmp.ne.s32.totalorder %s597_s22, 0 }
  0xbe   : > { %p604_p1 = scmp.ge.s32.totalorder %s423_s12, 2  ;;  %s212_s4 = scalar_lea.sflag [#allocation4], %s211_s3 }
  0xc0   : > { %p291_p3 = pnand %p604_p1, %p603_p13 }
  0xc2   : > { %p292_p5 = pneg %p291_p3 }
  0xc4   : > { %406 = dma.done.wait (%p292_p5), %s212_s4, 128  }
  0xc5   : > { %408 = vsyncadd (%p292_p5), %s212_s4, 4294967168  ;;  %p15_p8 = scmp.ge.s32.totalorder %s470_s15, 4   ;;  %s605_s9 = smov %s415_s10 }
  0xc6   : > { %s606_s10 = smov %s419_s11  ;;  %s607_s11 = smov %s482_s18 }
  0xc7   : > { %s608_s12 = smov %s470_s15  ;;  %17 = sbr.rel (!%p15_p8) target bundleno = 5 (0x5), region = 73 }
  0xcc   :  { %217 = vsyncpa [#allocation3], 1 }
  0xcd   :  { %219 = vsyncpa [#allocation3 + $0x1], 1 }
  0xce   :  { %220 = vsyncpa [#allocation4], 1 }
  0xcf   :  { %222 = vsyncpa [#allocation4 + $0x1], 1 }

</bundles_post_ra>
